<compile_context>
chip_gen: v7x
topology: tpu7x:2x2x1
jax: 0.10.0
libtpu: 0.0.40
codegen_flags: <defaults>
</compile_context>

<pallas_src>
import jax
import jax.numpy as jnp
from jax.experimental import pallas as pl
from jax.experimental.pallas import tpu as pltpu

HIDDEN = 64          # logical hidden width (matches nn.Linear(input_dim, 64))
HIDDEN_PAD = 128     # lane-padded hidden width
LANE = 128
SUBLANE_BF16 = 16    # bf16 packs 16 sublanes / vreg


def _round_up(x, m):
    return ((x + m - 1) // m) * m


def qnetwork_kernel(x_ref, w1_ref, b1_ref, w2_ref, b2_ref, out_ref):
    # x_ref: (TILE_B, D_in) bf16, w1_ref: (D_in, 128) bf16, b1_ref: (1, 128) f32
    # w2_ref: (128, OUT_PAD) bf16, b2_ref: (1, OUT_PAD) f32, out_ref: (TILE_B, OUT_PAD) f32
    h = jnp.dot(x_ref[...], w1_ref[...],
                preferred_element_type=jnp.float32)           # MXU, f32 acc
    h = jnp.maximum(h + b1_ref[...], 0.0)                     # f32 VPU bias+ReLU
    y = jnp.dot(h.astype(jnp.bfloat16), w2_ref[...],
                preferred_element_type=jnp.float32)           # MXU, f32 acc
    out_ref[...] = y + b2_ref[...]                            # lane-dense f32 store


def qnetwork_forward(x, w1, b1, w2, b2, *, tile_b=512):
    """y = relu(x @ w1 + b1) @ w2 + b2, x:(B,D_in), w1:(D_in,64), w2:(64,D_out)."""
    B, d_in = x.shape
    hidden, out_dim = w2.shape
    out_pad = _round_up(out_dim, LANE)

    # Batch tile: big enough to hit HBM roofline at large B, but never larger
    # than the (sublane-rounded) batch itself.  Always a multiple of 16 so the
    # bf16 x tile and f32 out tile satisfy sublane tiling.
    tile_b = min(tile_b, _round_up(B, SUBLANE_BF16))
    tile_b = _round_up(tile_b, SUBLANE_BF16)
    n_tiles = pl.cdiv(B, tile_b)
    b_pad = n_tiles * tile_b

    # ---- wrapper-side layout plumbing (pad + cast MXU operands to bf16) ----
    x_p = jnp.zeros((b_pad, d_in), jnp.bfloat16).at[:B].set(x.astype(jnp.bfloat16))
    w1_p = jnp.zeros((d_in, HIDDEN_PAD), jnp.bfloat16).at[:, :hidden].set(
        w1.astype(jnp.bfloat16))
    b1_p = jnp.zeros((1, HIDDEN_PAD), jnp.float32).at[:, :hidden].set(
        b1.reshape(1, hidden).astype(jnp.float32))
    w2_p = jnp.zeros((HIDDEN_PAD, out_pad), jnp.bfloat16).at[:hidden, :out_dim].set(
        w2.astype(jnp.bfloat16))
    b2_p = jnp.zeros((1, out_pad), jnp.float32).at[:, :out_dim].set(
        b2.reshape(1, out_dim).astype(jnp.float32))

    y_pad = pl.pallas_call(
        qnetwork_kernel,
        out_shape=jax.ShapeDtypeStruct((b_pad, out_pad), jnp.float32),
        grid_spec=pltpu.PrefetchScalarGridSpec(
            num_scalar_prefetch=0,
            grid=(n_tiles,),
            in_specs=[
                # x: streamed / double-buffered per batch tile
                pl.BlockSpec((tile_b, d_in), lambda i: (i, 0)),
                # weights & biases: constant index_map -> VMEM-resident
                pl.BlockSpec((d_in, HIDDEN_PAD), lambda i: (0, 0)),
                pl.BlockSpec((1, HIDDEN_PAD), lambda i: (0, 0)),
                pl.BlockSpec((HIDDEN_PAD, out_pad), lambda i: (0, 0)),
                pl.BlockSpec((1, out_pad), lambda i: (0, 0)),
            ],
            out_specs=pl.BlockSpec((tile_b, out_pad), lambda i: (i, 0)),
        ),
        compiler_params=pltpu.CompilerParams(
            dimension_semantics=("parallel",),   # 2-TC split on v7x, no-op on v5e/v6e
        ),
    )(x_p, w1_p, b1_p, w2_p, b2_p)

    # Slice off batch + output-lane padding.
    return y_pad[:B, :out_dim]


def init_params(key, input_dim, output_dim, hidden=HIDDEN):
    # Deterministic init mimicking nn.Linear's uniform(-1/sqrt(fan_in), 1/sqrt(fan_in)).
    k1, k2, k3, k4 = jax.random.split(key, 4)
    bound1 = 1.0 / jnp.sqrt(jnp.float32(input_dim))
    bound2 = 1.0 / jnp.sqrt(jnp.float32(hidden))
    w1 = jax.random.uniform(k1, (input_dim, hidden), jnp.float32, -bound1, bound1)
    b1 = jax.random.uniform(k2, (hidden,), jnp.float32, -bound1, bound1)
    w2 = jax.random.uniform(k3, (hidden, output_dim), jnp.float32, -bound2, bound2)
    b2 = jax.random.uniform(k4, (output_dim,), jnp.float32, -bound2, bound2)
    return w1, b1, w2, b2


if __name__ == "__main__":
    input_dim = 16
    output_dim = 8
    batch = 64

    key = jax.random.PRNGKey(0)
    kx, kp = jax.random.split(key)
    x = jax.random.normal(kx, (batch, input_dim), dtype=jnp.float32)
    w1, b1, w2, b2 = init_params(kp, input_dim, output_dim)

    out = qnetwork_forward(x, w1, b1, w2, b2)
    out = jax.block_until_ready(out)

    # Full-f32 reference (same math as the PyTorch module); kernel uses bf16
    # MXU operands with f32 accumulation, so allow bf16-level tolerance.
    ref = jnp.maximum(x @ w1 + b1[None, :], 0.0) @ w2 + b2[None, :]
    assert out.shape == (batch, output_dim)
    assert jnp.allclose(out, ref, atol=2e-2, rtol=2e-2), (
        float(jnp.max(jnp.abs(out - ref))))

    print("KERNEL_OK")
</pallas_src>

<mosaic_0001>
module attributes {stable_mosaic.version = 11 : i64} {
  func.func @qnetwork_kernel(%arg0: i32, %arg1: memref<64x16xbf16, #tpu.memory_space<vmem>>, %arg2: memref<16x128xbf16, #tpu.memory_space<vmem>>, %arg3: memref<1x128xf32, #tpu.memory_space<vmem>>, %arg4: memref<128x128xbf16, #tpu.memory_space<vmem>>, %arg5: memref<1x128xf32, #tpu.memory_space<vmem>>, %arg6: memref<64x128xf32, #tpu.memory_space<vmem>>) attributes {dimension_semantics = [#tpu.dimension_semantics<parallel>], iteration_bounds = array<i64: 1>, scalar_prefetch = 0 : i64, scratch_operands = 0 : i64, tpu.core_type = #tpu.core_type<tc>, window_params = [{transform_indices = @transform_0, window_bounds = array<i64: 64, 16>}, {pipeline_mode = #tpu.pipeline_mode<synchronous>, transform_indices = @transform_1, window_bounds = array<i64: 16, 128>}, {pipeline_mode = #tpu.pipeline_mode<synchronous>, transform_indices = @transform_2, window_bounds = array<i64: 1, 128>}, {pipeline_mode = #tpu.pipeline_mode<synchronous>, transform_indices = @transform_3, window_bounds = array<i64: 128, 128>}, {pipeline_mode = #tpu.pipeline_mode<synchronous>, transform_indices = @transform_4, window_bounds = array<i64: 1, 128>}, {transform_indices = @transform_5, window_bounds = array<i64: 64, 128>}]} {
    %c0 = arith.constant 0 : index
    %c0_0 = arith.constant 0 : index
    %0 = vector.load %arg1[%c0, %c0_0] : memref<64x16xbf16, #tpu.memory_space<vmem>>, vector<64x16xbf16>
    %c0_1 = arith.constant 0 : index
    %c0_2 = arith.constant 0 : index
    %1 = vector.load %arg2[%c0_1, %c0_2] : memref<16x128xbf16, #tpu.memory_space<vmem>>, vector<16x128xbf16>
    %cst = arith.constant dense<0.000000e+00> : vector<64x128xf32>
    %2 = tpu.matmul %0, %1, %cst {dimension_numbers = #tpu.dot_dimension_numbers<[1], [0], [0], [1], [0, 0, 1, 1], [], []>} : vector<64x16xbf16>, vector<16x128xbf16>, vector<64x128xf32> -> vector<64x128xf32>
    %c0_3 = arith.constant 0 : index
    %c0_4 = arith.constant 0 : index
    %3 = vector.load %arg3[%c0_3, %c0_4] : memref<1x128xf32, #tpu.memory_space<vmem>>, vector<1x128xf32>
    %4 = vector.broadcast %3 : vector<1x128xf32> to vector<64x128xf32>
    %5 = arith.addf %2, %4 : vector<64x128xf32>
    %cst_5 = arith.constant 0.000000e+00 : f32
    %6 = vector.broadcast %cst_5 : f32 to vector<64x128xf32>
    %7 = arith.maximumf %5, %6 : vector<64x128xf32>
    %8 = arith.truncf %7 : vector<64x128xf32> to vector<64x128xbf16>
    %c0_6 = arith.constant 0 : index
    %c0_7 = arith.constant 0 : index
    %9 = vector.load %arg4[%c0_6, %c0_7] : memref<128x128xbf16, #tpu.memory_space<vmem>>, vector<128x128xbf16>
    %cst_8 = arith.constant dense<0.000000e+00> : vector<64x128xf32>
    %10 = tpu.matmul %8, %9, %cst_8 {dimension_numbers = #tpu.dot_dimension_numbers<[1], [0], [0], [1], [0, 0, 1, 1], [], []>} : vector<64x128xbf16>, vector<128x128xbf16>, vector<64x128xf32> -> vector<64x128xf32>
    %c0_9 = arith.constant 0 : index
    %c0_10 = arith.constant 0 : index
    %11 = vector.load %arg5[%c0_9, %c0_10] : memref<1x128xf32, #tpu.memory_space<vmem>>, vector<1x128xf32>
    %12 = vector.broadcast %11 : vector<1x128xf32> to vector<64x128xf32>
    %13 = arith.addf %10, %12 : vector<64x128xf32>
    %c0_11 = arith.constant 0 : index
    %c0_12 = arith.constant 0 : index
    %14 = vector.load %arg6[%c0_11, %c0_12] : memref<64x128xf32, #tpu.memory_space<vmem>>, vector<64x128xf32>
    tpu.vector_store %arg6[%c0_11, %c0_12], %13 {strides = array<i32>} : memref<64x128xf32, #tpu.memory_space<vmem>>, vector<64x128xf32>,
    return
  }
  func.func @transform_0(%arg0: i32) -> (i32, i32) {
    %c0_i32 = arith.constant 0 : i32
    %c0_i32_0 = arith.constant 0 : i32
    return %arg0, %c0_i32 : i32, i32
  }
  func.func @transform_1(%arg0: i32) -> (i32, i32) {
    %c0_i32 = arith.constant 0 : i32
    %c0_i32_0 = arith.constant 0 : i32
    %c0_i32_1 = arith.constant 0 : i32
    return %c0_i32, %c0_i32_0 : i32, i32
  }
  func.func @transform_2(%arg0: i32) -> (i32, i32) {
    %c0_i32 = arith.constant 0 : i32
    %c0_i32_0 = arith.constant 0 : i32
    %c0_i32_1 = arith.constant 0 : i32
    return %c0_i32, %c0_i32_0 : i32, i32
  }
  func.func @transform_3(%arg0: i32) -> (i32, i32) {
    %c0_i32 = arith.constant 0 : i32
    %c0_i32_0 = arith.constant 0 : i32
    %c0_i32_1 = arith.constant 0 : i32
    return %c0_i32, %c0_i32_0 : i32, i32
  }
  func.func @transform_4(%arg0: i32) -> (i32, i32) {
    %c0_i32 = arith.constant 0 : i32
    %c0_i32_0 = arith.constant 0 : i32
    %c0_i32_1 = arith.constant 0 : i32
    return %c0_i32, %c0_i32_0 : i32, i32
  }
  func.func @transform_5(%arg0: i32) -> (i32, i32) {
    %c0_i32 = arith.constant 0 : i32
    %c0_i32_0 = arith.constant 0 : i32
    return %arg0, %c0_i32 : i32, i32
  }
}

</mosaic_0001>

<bundles_post_ra>
// kernel: tpu_custom_call.1
= control target key start
LH: loop header
LB: loop body
LE: loop exit
PB: predicated region body
PF: predicated region fallthrough
CT: control target
= control target key end

     0   :  { %10 = vsyncpa [#allocation3], 0  ;;  %s568_s0 = inlined_call_operand.vmem [shape: bf16[64,16], index: 0, kind: input, shape index: {}]   ;;  %s569_s1 = inlined_call_operand.vmem [shape: bf16[16,128], index: 1, kind: input, shape index: {}]   ;;  %s570_s2 = inlined_call_operand.vmem [shape: f32[1,128], index: 2, kind: input, shape index: {}]   ;;  %s571_s3 = inlined_call_operand.hbm [shape: bf16[128,128], index: 3, kind: input, shape index: {}]   ;;  %s572_s4 = inlined_call_operand.vmem [shape: f32[1,128], index: 4, kind: input, shape index: {}]   ;;  %s573_s5 = inlined_call_operand.hbm [shape: f32[64,128], index: 5, kind: output, shape index: {}]  }
   0x1   :  { %11 = vsyncpa [#allocation4], 0  ;;  %s483_s18 = smov [#allocation2]   ;;  %s435_s22 = scalar_lea.hbm %s571_s3, 1024 }
   0x2   :  { %s23_s19 = sshll.u32 %s483_s18, 4  ;;  %p436_p0 = scmp.ne.s32.totalorder %s571_s3, %s435_s22  ;;  %s24_s19 = int_to_ptr.vmem [resolvable:$true] %s23_s19 }
   0x3   :  { %p439_p1 = scmp.lt.u32.totalorder %s435_s22, %s571_s3 }
   0x5   :  { %p441_p2 = pnand %p439_p1, %p436_p0 }
   0x7   :  { %444 = shalt.err (!%p441_p2)
}
   0x8   :  { %s445_s27 = scalar_lea.vmem %s24_s19, 1024  ;;  %p450_p4 = scmp.lt.s32.totalorder %s24_s19, %s24_s19 }
   0x9   :  { %p446_p3 = scmp.ne.s32.totalorder %s24_s19, %s445_s27  ;;  %p451_p5 = scmp.lt.s32.totalorder %s445_s27, %s445_s27 }
   0xb   :  { %p452_p6 = por %p451_p5, %p450_p4 }
   0xd   :  { %p453_p7 = pnand %p452_p6, %p446_p3 }
   0xf   :  { %456 = shalt.err (!%p453_p7)
}
  0x10   :  { %s484_s28 = smov 64   ;;  %s485_s29 = smov 4  }
  0x11   :  { %29 = dma.hbm_to_vmem [thread:$0]  %s571_s3, 1024, %s24_s19, [#allocation3], %s484_s28, %s484_s28, %s485_s29  }
  0x12   :  { %479 = dma.done.wait [#allocation3], 1024  }
  0x13   :  { %480 = vsyncadd [#allocation3], 4294966272  ;;  %v422_v0 = vld [vmem:[%s569_s1] sm:$0xff]   ;;  %vm79_vm0 = vcmask 130048   ;;  %v424_v2 = vld [vmem:[%s568_s0 + $0x8] sm:$0xff]   ;;  %s486_s17 = smov [#allocation5]  }
  0x14   :  { %v423_v1 = vld [vmem:[%s568_s0] sm:$0xff]   ;;  %366 = vmatprep.subr.bf16.mxu0 %v422_v0  ;;  %v425_v3 = vld [vmem:[%s568_s0 + $0x10] sm:$0xff]   ;;  %v428_v5 = vld [vmem:[#allocation2 + $0x8] sm:$0xff]   ;;  %s318_s18 = sshll.u32 %s486_s17, 4  ;;  %s319_s18 = int_to_ptr.vmem [resolvable:$true] %s318_s18 }
  0x15   :  { %367 = vmatpush3.bf16.msra.mxu0 %v422_v0  ;;  %368 = vmatprep.mubr.msk.bf16.mxu0 %vm79_vm0, %v423_v1  ;;  %v427_v4 = vld [vmem:[#allocation2] sm:$0xff]   ;;  %v429_v6 = vld [vmem:[#allocation2 + $0x10] sm:$0xff]   ;;  %v426_v7 = vld [vmem:[%s568_s0 + $0x18] sm:$0xff]   ;;  %p462_p9 = scmp.lt.s32.totalorder %s319_s18, %s319_s18 }
  0x16   :  { %376 = vmatprep.subr.bf16.mxu0 %v427_v4  ;;  %400 = vmatprep.subr.bf16.mxu1 %v427_v4  ;;  %v430_v8 = vld [vmem:[#allocation2 + $0x18] sm:$0xff]   ;;  %v431_v9 = vld [vmem:[#allocation2 + $0x20] sm:$0xff]   ;;  %v432_v10 = vld [vmem:[#allocation2 + $0x28] sm:$0xff]  }
  0x17   :  { %408 = vmatpush3.bf16.msra.mxu1 %v427_v4  ;;  %v433_v11 = vld [vmem:[#allocation2 + $0x30] sm:$0xff]   ;;  %v434_v12 = vld [vmem:[#allocation2 + $0x38] sm:$0xff]   ;;  %v330_v13 = vld [vmem:[%s570_s2] ss:$0 sm:$0xff] }
  0x18   :  { %369 = vmatmul.mubr.msk.bf16.vlgmr.msra.gmra.mrb[0].mxu0 %vm79_vm0, %v424_v2  ;;  %401 = vmatprep.subr.bf16.mxu1 %v428_v5  ;;  %v340_v42 = vld [vmem:[%s572_s4] ss:$0 sm:$0xff]  ;;  %s457_s4 = scalar_lea.vmem %s319_s18, 1024 }
  0x19   :  { %372 = vmatprep.mubr.msk.bf16.mxu0 %vm79_vm0, %v425_v3  ;;  %377 = vmatpush3.bf16.msra.mxu0 %v427_v4  ;;  %p458_p8 = scmp.ne.s32.totalorder %s319_s18, %s457_s4  ;;  %p463_p10 = scmp.lt.s32.totalorder %s457_s4, %s457_s4 }
  0x1a   :  { %378 = vmatprep.subr.bf16.mxu0 %v428_v5 }
  0x1b   :  { %409 = vmatpush3.bf16.msra.mxu1 %v428_v5  ;;  %p464_p11 = por %p463_p10, %p462_p9 }
  0x1c   :  { %402 = vmatprep.subr.bf16.mxu1 %v429_v6 }
  0x1d   :  { %379 = vmatpush3.bf16.msra.mxu0 %v428_v5  ;;  %p465_p12 = pnand %p464_p11, %p458_p8 }
  0x1e   :  { %380 = vmatprep.subr.bf16.mxu0 %v429_v6 }
  0x1f   :  { %410 = vmatpush3.bf16.msra.mxu1 %v429_v6 }
  0x20   :  { %373 = vmatmul.mubr.msk.bf16.gmra.mrb[4].mxu0 %vm79_vm0, %v426_v7  ;;  %403 = vmatprep.subr.bf16.mxu1 %v430_v8 }
  0x21   :  { %381 = vmatpush3.bf16.msra.mxu0 %v429_v6 }
  0x22   :  { %382 = vmatprep.subr.bf16.mxu0 %v430_v8 }
  0x23   :  { %411 = vmatpush3.bf16.msra.mxu1 %v430_v8 }
  0x24   :  { %404 = vmatprep.subr.bf16.mxu1 %v431_v9 }
  0x25   :  { %383 = vmatpush3.bf16.msra.mxu0 %v430_v8 }
  0x26   :  { %384 = vmatprep.subr.bf16.mxu0 %v431_v9 }
  0x27   :  { %412 = vmatpush3.bf16.msra.mxu1 %v431_v9 }
  0x28   :  { %405 = vmatprep.subr.bf16.mxu1 %v432_v10 }
  0x29   :  { %385 = vmatpush3.bf16.msra.mxu0 %v431_v9 }
  0x2a   :  { %386 = vmatprep.subr.bf16.mxu0 %v432_v10 }
  0x2b   :  { %413 = vmatpush3.bf16.msra.mxu1 %v432_v10 }
  0x2c   :  { %406 = vmatprep.subr.bf16.mxu1 %v433_v11 }
  0x2d   :  { %387 = vmatpush3.bf16.msra.mxu0 %v432_v10 }
  0x2e   :  { %388 = vmatprep.subr.bf16.mxu0 %v433_v11 }
  0x2f   :  { %414 = vmatpush3.bf16.msra.mxu1 %v433_v11 }
  0x30   :  { %407 = vmatprep.subr.bf16.mxu1 %v434_v12 }
  0x31   :  { %389 = vmatpush3.bf16.msra.mxu0 %v433_v11 }
  0x32   :  { %390 = vmatprep.subr.bf16.mxu0 %v434_v12 }
  0x33   :  { %415 = vmatpush3.bf16.msra.mxu1 %v434_v12 }
  0x35   :  { %391 = vmatpush3.bf16.msra.mxu0 %v434_v12 }
  0xeb   :  { %v370_v14 = vpop.f32.mrb[0].mxu0 }
  0xec   :  { %v135_v15 = vadd.f32 %v370_v14, %v330_v13  ;;  %v126_v16 = vpop.f32.mrb[1].mxu0 }
  0xed   :  { %v127_v17 = vadd.f32 %v330_v13, %v126_v16  ;;  %v371_v18 = vpop.f32.mrb[2].mxu0 }
  0xee   :  { %v138_v19 = vadd.f32 %v371_v18, %v330_v13  ;;  %v129_v20 = vpop.f32.mrb[3].mxu0  ;;  %v159_v22 = vmax.f32 %v135_v15, 0.0 }
  0xef   :  { %v130_v21 = vadd.f32 %v330_v13, %v129_v20  ;;  %v157_v24 = vmax.f32 %v127_v17, 0.0 }
  0xf0   :  { %v160_v23 = vmax.f32 %v138_v19, 0.0 }
  0xf1   :  { %v158_v25 = vmax.f32 %v130_v21, 0.0 }
  0xf2   :  { %v166_v26 = vpack.c.bf16 %v160_v23, %v159_v22 }
  0xf3   :  { %v165_v27 = vpack.c.bf16 %v158_v25, %v157_v24  ;;  %v374_v28 = vpop.f32.mrb[4].mxu0 }
  0xf4   :  { %v151_v29 = vadd.f32 %v374_v28, %v330_v13  ;;  %v142_v30 = vpop.f32.mrb[5].mxu0 }
  0xf5   :  { %v143_v31 = vadd.f32 %v330_v13, %v142_v30  ;;  %v375_v32 = vpop.f32.mrb[6].mxu0  ;;  %392 = vmatprep.mubr.bf16.mxu0 %v165_v27 }
  0xf6   :  { %v154_v33 = vadd.f32 %v375_v32, %v330_v13  ;;  %v145_v34 = vpop.f32.mrb[7].mxu0  ;;  %393 = vmatmul.mubr.bf16.vlgmr.msra.gmra.mrb[8].mxu0 %v166_v26  ;;  %v163_v36 = vmax.f32 %v151_v29, 0.0 }
  0xf7   :  { %v146_v35 = vadd.f32 %v330_v13, %v145_v34  ;;  %v161_v38 = vmax.f32 %v143_v31, 0.0 }
  0xf8   :  { %v164_v37 = vmax.f32 %v154_v33, 0.0 }
  0xf9   :  { %v162_v39 = vmax.f32 %v146_v35, 0.0 }
  0xfa   :  { %v168_v40 = vpack.c.bf16 %v164_v37, %v163_v36 }
  0xfb   :  { %v167_v41 = vpack.c.bf16 %v162_v39, %v161_v38 }
  0xfd   :  { %396 = vmatprep.mubr.bf16.mxu1 %v167_v41 }
  0xfe   :  { %397 = vmatmul.mubr.bf16.vlgmr.msra.gmra.mrb[0].mxu1 %v168_v40 }
 0x1c9   :  { %v394_v43 = vpop.f32.mrb[8].mxu0 }
 0x1ca   :  { %v283_v44 = vadd.f32 %v394_v43, %v340_v42  ;;  %v274_v45 = vpop.f32.mrb[9].mxu0 }
 0x1cb   :  { %v275_v46 = vadd.f32 %v340_v42, %v274_v45  ;;  %v395_v47 = vpop.f32.mrb[10].mxu0 }
 0x1cc   :  { %307 = vst [vmem:[#allocation5 + $0x10] sm:$0xff] %v283_v44  ;;  %v286_v48 = vadd.f32 %v395_v47, %v340_v42  ;;  %v277_v49 = vpop.f32.mrb[11].mxu0 }
 0x1cd   :  { %305 = vst [vmem:[#allocation5] sm:$0xff] %v275_v46  ;;  %v278_v50 = vadd.f32 %v340_v42, %v277_v49 }
 0x1ce   :  { %308 = vst [vmem:[#allocation5 + $0x18] sm:$0xff] %v286_v48 }
 0x1cf   :  { %306 = vst [vmem:[#allocation5 + $0x8] sm:$0xff] %v278_v50 }
 0x1d1   :  { %v398_v51 = vpop.f32.mrb[0].mxu1 }
 0x1d2   :  { %v299_v52 = vadd.f32 %v398_v51, %v340_v42  ;;  %v290_v53 = vpop.f32.mrb[1].mxu1 }
 0x1d3   :  { %v291_v54 = vadd.f32 %v340_v42, %v290_v53  ;;  %v399_v55 = vpop.f32.mrb[2].mxu1 }
 0x1d4   :  { %311 = vst [vmem:[#allocation5 + $0x30] sm:$0xff] %v299_v52  ;;  %v302_v56 = vadd.f32 %v399_v55, %v340_v42  ;;  %v293_v57 = vpop.f32.mrb[3].mxu1 }
 0x1d5   :  { %309 = vst [vmem:[#allocation5 + $0x20] sm:$0xff] %v291_v54  ;;  %v294_v58 = vadd.f32 %v340_v42, %v293_v57 }
 0x1d6   :  { %312 = vst [vmem:[#allocation5 + $0x38] sm:$0xff] %v302_v56 }
 0x1d7   :  { %310 = vst [vmem:[#allocation5 + $0x28] sm:$0xff] %v294_v58 }
 0x1d8   :  { %468 = shalt.err (!%p465_p12)
}
 0x1d9   :  { %s469_s21 = scalar_lea.hbm %s573_s5, 1024 }
 0x1da   :  { %p470_p13 = scmp.ne.s32.totalorder %s573_s5, %s469_s21  ;;  %p473_p0 = scmp.lt.u32.totalorder %s469_s21, %s573_s5 }
 0x1dc   :  { %p475_p1 = pnand %p473_p0, %p470_p13 }
 0x1de   :  { %478 = shalt.err (!%p475_p1)
}
 0x1df   :  { %s487_s26 = smov 128   ;;  %s488_s27 = smov 8  }
 0x1e0   :  { %324 = dma.vmem_to_hbm [thread:$0]  %s319_s18, 1024, %s573_s5, [#allocation4], %s487_s26, %s487_s26, %s488_s27  }
 0x1e1   :  { %481 = dma.done.wait [#allocation4], 1024  }
 0x1e2   :  { %482 = vsyncadd [#allocation4], 4294966272 }
 0x1e3   :  { %328 = vsyncpa [#allocation3], 1 }
 0x1e4   :  { %329 = vsyncpa [#allocation4], 1 }

</bundles_post_ra>
